<compile_context>
chip_gen: v7x
topology: tpu7x:2x2x1
jax: 0.10.0
libtpu: 0.0.40
codegen_flags: <defaults>
</compile_context>

<pallas_src>
import functools

import jax
import jax.numpy as jnp
import numpy as np
from jax.experimental import pallas as pl
from jax.experimental.pallas import tpu as pltpu


# --------------------------------- kernel -----------------------------------

def _read_unit_kernel(mem_ref, know_ref, ctrl_ref, wm_ref, bm_ref,
                      a_ref, read_ref, attn_ref, v_sc,
                      *, n_memories, approx_recip):
    """One grid step == one batch tile, all memory heads fused.

    mem_ref  : (n_mem, tb, dim)        memory[-1] stacked over heads (matmul dtype)
    know_ref : (tb, S, dim)            knowledge, lane-dense over dim (matmul dtype)
    ctrl_ref : (tb, dim)               control[-1] (matmul dtype)
    wm_ref   : (n_mem, dim, dim)       mem[i].weight (out, in)
    bm_ref   : (n_mem, 1, dim)         mem[i].bias (f32)
    a_ref    : (dim, 2*n_mem*dim)      [wa ⊙ wc1 | wa ⊙ wc2] for all heads,
                                       head-blocks along the lane dim
    read_ref : (tb, n_mem, dim)        f32 read vectors
    attn_ref : (tb, n_mem, S)          f32 attention maps (== saved_attns)
    v_sc     : (tb, n_mem, dim)        VMEM scratch assembling the per-head
                                       logit vectors in batch-major layout
    """
    f32 = jnp.float32
    mm = know_ref.dtype
    dim = ctrl_ref.shape[1]

    know = know_ref[...]                                   # (tb, S, dim)
    ctrl = ctrl_ref[...]                                   # (tb, dim)

    # One fused MXU matmul for every head's control projections
    # (wa folded into wc on the host): u_all[b, i*dim+k]  = u1_i[b,k]
    #                                  u_all[b, (n+i)*dim+k] = u2_i[b,k]
    u_all = jax.lax.dot_general(ctrl, a_ref[...], (((1,), (0,)), ((), ())),
                                preferred_element_type=f32)  # (tb, 2*n_mem*dim)

    # Per-head weight-space work: only M = tb rows per matmul (the rank-1
    # rewrite removed the (tb*S)-row matmuls).  n_memories is small, so a
    # static unroll costs nothing and keeps every dot a plain 2-D MXU matmul.
    for i in range(n_memories):
        # mem_proj[b,d] = memory[i] @ wm[i].T + bm[i]
        mem_proj = jax.lax.dot_general(
            mem_ref[i], wm_ref[i], (((1,), (1,)), ((), ())),
            preferred_element_type=f32) + bm_ref[i]                      # (tb, dim)
        u1 = u_all[:, i * dim:(i + 1) * dim]                             # (tb, dim)
        u2 = u_all[:, (n_memories + i) * dim:(n_memories + i + 1) * dim]
        v_sc[:, i, :] = (u1 * mem_proj + u2).astype(v_sc.dtype)

    # logits[b,i,s] = sum_k v[b,i,k] * know[b,s,k]    (leading-batch MXU dot)
    # bc / ba are constant along s and cancel in the softmax -> dropped.
    logits = jnp.einsum('bik,bsk->bis', v_sc[...], know,
                        preferred_element_type=f32)                      # (tb, n_mem, S)

    # numerically stable softmax over S, entirely in f32
    m = jnp.max(logits, axis=-1, keepdims=True)
    p = jnp.exp(logits - m)
    denom = jnp.sum(p, axis=-1, keepdims=True)
    if approx_recip:                                   # EUP reciprocal (bf16 mode)
        attn = p * pl.reciprocal(denom, approx=True)
    else:                                              # exact path for f32 checks
        attn = p / denom
    attn_ref[...] = attn.astype(attn_ref.dtype)

    # read[b,i,d] = sum_s attn[b,i,s] * know[b,s,d]   (leading-batch MXU dot)
    read = jnp.einsum('bis,bsd->bid', attn.astype(mm), know,
                      preferred_element_type=f32)
    read_ref[...] = read.astype(read_ref.dtype)


# -------------------------------- wrapper ------------------------------------

def read_unit_forward(memory_stack, know, control, params, *,
                      mm_dtype=jnp.float32, batch_block=None,
                      vmem_limit_bytes=None):
    """memory_stack: (n_mem, B, dim); know: (B, dim, S) (NCW, as in the module);
    control: (B, dim).  Returns (reads, attns) with reads (B, n_mem, dim) and
    attns (B, n_mem, S), both float32."""
    n_mem, B, dim = memory_stack.shape
    S = know.shape[-1]
    wm, bm, wc, bc, wa, ba = params
    del bc, ba  # constant per softmax row -> mathematically irrelevant to the output

    mm_np = np.dtype(mm_dtype)
    use_bf16 = mm_np == np.dtype(jnp.bfloat16)
    f32 = jnp.float32

    # ---- host-side parameter folding & layout plumbing (no kernel compute) ----
    know_t = jnp.transpose(know, (0, 2, 1)).astype(mm_dtype)   # (B, S, dim) lane-dense
    wa_col = wa[:, 0, :, None]                                 # (n_mem, dim, 1)
    a1 = wa_col * wc[:, :, :dim]                               # (n_mem, dim, dim)
    a2 = wa_col * wc[:, :, dim:]                               # (n_mem, dim, dim)
    # Flatten all heads into one weight matrix so the kernel runs ONE matmul:
    #   A[d, i*dim+k]           = wa[i,d]*wc[i,d,k]            (u1 blocks)
    #   A[d, n_mem*dim+i*dim+k] = wa[i,d]*wc[i,d,dim+k]        (u2 blocks)
    A1 = jnp.transpose(a1, (1, 0, 2)).reshape(dim, n_mem * dim)
    A2 = jnp.transpose(a2, (1, 0, 2)).reshape(dim, n_mem * dim)
    A = jnp.concatenate([A1, A2], axis=1).astype(mm_dtype)     # (dim, 2*n_mem*dim)
    wm_c = wm.astype(mm_dtype)
    mem_c = memory_stack.astype(mm_dtype)
    ctrl_c = control.astype(mm_dtype)
    bm_f = bm.astype(f32)

    tb = B if batch_block is None else batch_block
    assert B % tb == 0 and (tb == B or tb % 8 == 0), \
        "batch_block must divide B and be a multiple of 8 when < B"
    grid = (B // tb,)

    flops = int(n_mem * B * (6 * dim * dim + 4 * S * dim))
    bytes_accessed = int(
        (mem_c.size + know_t.size + ctrl_c.size + wm_c.size + A.size)
        * mm_np.itemsize
        + bm_f.size * 4 + B * n_mem * (dim + S) * 4)
    cost = pl.CostEstimate(flops=flops, transcendentals=int(n_mem * B * S),
                           bytes_accessed=bytes_accessed)

    cp = dict(dimension_semantics=("parallel",))
    if vmem_limit_bytes is not None:
        cp["vmem_limit_bytes"] = vmem_limit_bytes   # v7x: budget 64 MiB/TC explicitly

    kernel = functools.partial(_read_unit_kernel,
                               n_memories=n_mem, approx_recip=use_bf16)

    reads, attns = pl.pallas_call(
        kernel,
        out_shape=(jax.ShapeDtypeStruct((B, n_mem, dim), jnp.float32),
                   jax.ShapeDtypeStruct((B, n_mem, S), jnp.float32)),
        grid_spec=pltpu.PrefetchScalarGridSpec(
            num_scalar_prefetch=0,
            grid=grid,
            in_specs=[
                pl.BlockSpec((n_mem, tb, dim), lambda b: (0, b, 0)),      # memory (all heads)
                pl.BlockSpec((tb, S, dim), lambda b: (b, 0, 0)),          # knowledge
                pl.BlockSpec((tb, dim), lambda b: (b, 0)),                # control
                pl.BlockSpec((n_mem, dim, dim), lambda b: (0, 0, 0)),     # wm
                pl.BlockSpec((n_mem, 1, dim), lambda b: (0, 0, 0)),       # bm
                pl.BlockSpec((dim, 2 * n_mem * dim), lambda b: (0, 0)),   # A = wa ⊙ wc (all heads)
            ],
            out_specs=[
                pl.BlockSpec((tb, n_mem, dim), lambda b: (b, 0, 0)),      # reads
                pl.BlockSpec((tb, n_mem, S), lambda b: (b, 0, 0)),        # attns
            ],
            scratch_shapes=[pltpu.VMEM((tb, n_mem, dim), mm_dtype)],
        ),
        compiler_params=pltpu.CompilerParams(**cp),
        cost_estimate=cost,
    )(mem_c, know_t, ctrl_c, wm_c, bm_f, A)

    return reads, attns


def reads_as_list(reads):
    """Match the PyTorch module's return type: list of n_mem (B, dim) tensors."""
    return [reads[:, i, :] for i in range(reads.shape[1])]


# ----------------------------- parameter init --------------------------------

def _xavier_uniform(key, shape):
    fan_out, fan_in = shape[-2], shape[-1]
    bound = (6.0 / (fan_in + fan_out)) ** 0.5
    return jax.random.uniform(key, shape, jnp.float32, -bound, bound)


def init_read_unit_params(key, dim, n_memories):
    k1, k2, k3 = jax.random.split(key, 3)
    wm = _xavier_uniform(k1, (n_memories, dim, dim))
    bm = jnp.zeros((n_memories, 1, dim), jnp.float32)
    wc = _xavier_uniform(k2, (n_memories, dim, 2 * dim))
    bc = jnp.zeros((n_memories, 1, dim), jnp.float32)
    wa = _xavier_uniform(k3, (n_memories, 1, dim))
    ba = jnp.zeros((n_memories, 1, 1), jnp.float32)
    return wm, bm, wc, bc, wa, ba


# ----------------------------- pure-JAX reference ----------------------------

def read_unit_reference(memory_stack, know, control, params):
    wm, bm, wc, bc, wa, ba = params
    reads, attns = [], []
    for i in range(memory_stack.shape[0]):
        mem = memory_stack[i] @ wm[i].T + bm[i, 0]               # (B, dim)
        mk = mem[:, :, None] * know                              # (B, dim, S)
        cat = jnp.concatenate([mk, know], axis=1)                # (B, 2*dim, S)
        cat = jnp.transpose(cat, (0, 2, 1))                      # (B, S, 2*dim)
        concat = cat @ wc[i].T + bc[i, 0]                        # (B, S, dim)
        a_in = concat * control[:, None, :]
        logits = (a_in @ wa[i].T)[..., 0] + ba[i, 0, 0]          # (B, S)
        a = jax.nn.softmax(logits, axis=1)
        attns.append(a)
        reads.append(jnp.sum(a[:, None, :] * know, axis=2))      # (B, dim)
    return jnp.stack(reads, axis=1), jnp.stack(attns, axis=1)    # (B,n_mem,dim),(B,n_mem,S)


# ---------------------------------- main --------------------------------------

if __name__ == "__main__":
    B, dim, S, n_memories = 2, 32, 8, 3

    key = jax.random.PRNGKey(0)
    kp, km, kk, kc, kb1, kb2, kb3 = jax.random.split(key, 7)

    wm, bm, wc, bc, wa, ba = init_read_unit_params(kp, dim, n_memories)
    # The module zero-inits biases; use small random biases here to actually
    # exercise the bias paths (and verify that bc/ba cancel in the softmax).
    bm = 0.1 * jax.random.normal(kb1, bm.shape, jnp.float32)
    bc = 0.1 * jax.random.normal(kb2, bc.shape, jnp.float32)
    ba = 0.1 * jax.random.normal(kb3, ba.shape, jnp.float32)
    params = (wm, bm, wc, bc, wa, ba)

    memory_stack = jax.random.normal(km, (n_memories, B, dim), jnp.float32)
    know = jax.random.normal(kk, (B, dim, S), jnp.float32)       # NCW, as in the module
    control = jax.random.normal(kc, (B, dim), jnp.float32)

    ref_reads, ref_attns = read_unit_reference(memory_stack, know, control, params)

    # f32 matmul path: tight comparison against the naive reference
    reads, attns = read_unit_forward(memory_stack, know, control, params,
                                     mm_dtype=jnp.float32)
    reads, attns = jax.block_until_ready((reads, attns))
    np.testing.assert_allclose(np.asarray(reads), np.asarray(ref_reads),
                               rtol=1e-4, atol=1e-4)
    np.testing.assert_allclose(np.asarray(attns), np.asarray(ref_attns),
                               rtol=1e-4, atol=1e-4)

    # bf16 MXU-input path (v6e/v7x): loose sanity check, accumulation stays f32
    reads_bf, attns_bf = read_unit_forward(memory_stack, know, control, params,
                                           mm_dtype=jnp.bfloat16)
    reads_bf = jax.block_until_ready(reads_bf)
    np.testing.assert_allclose(np.asarray(reads_bf), np.asarray(ref_reads),
                               rtol=1e-1, atol=1e-1)

    # module-style list of per-head (B, dim) reads
    per_head = reads_as_list(reads)
    assert len(per_head) == n_memories and per_head[0].shape == (B, dim)

    # TODO(synk): `self.saved_attns` is module side-state; it is exposed here as
    # the second pallas output `attns` instead of being stored on an object.

    print("KERNEL_OK")
</pallas_src>

<mosaic_0001>
module attributes {stable_mosaic.version = 11 : i64} {
  func.func @_read_unit_kernel(%arg0: i32, %arg1: memref<3x2x32xf32, #tpu.memory_space<vmem>>, %arg2: memref<2x8x32xf32, #tpu.memory_space<vmem>>, %arg3: memref<2x32xf32, #tpu.memory_space<vmem>>, %arg4: memref<3x32x32xf32, #tpu.memory_space<vmem>>, %arg5: memref<3x1x32xf32, #tpu.memory_space<vmem>>, %arg6: memref<32x192xf32, #tpu.memory_space<vmem>>, %arg7: memref<2x3x32xf32, #tpu.memory_space<vmem>>, %arg8: memref<2x3x8xf32, #tpu.memory_space<vmem>>, %arg9: memref<2x3x32xf32, #tpu.memory_space<vmem>>) attributes {dimension_semantics = [#tpu.dimension_semantics<parallel>], iteration_bounds = array<i64: 1>, scalar_prefetch = 0 : i64, scratch_operands = 1 : i64, tpu.core_type = #tpu.core_type<tc>, window_params = [{transform_indices = @transform_0, window_bounds = array<i64: 3, 2, 32>}, {transform_indices = @transform_1, window_bounds = array<i64: 2, 8, 32>}, {transform_indices = @transform_2, window_bounds = array<i64: 2, 32>}, {pipeline_mode = #tpu.pipeline_mode<synchronous>, transform_indices = @transform_3, window_bounds = array<i64: 3, 32, 32>}, {pipeline_mode = #tpu.pipeline_mode<synchronous>, transform_indices = @transform_4, window_bounds = array<i64: 3, 1, 32>}, {pipeline_mode = #tpu.pipeline_mode<synchronous>, transform_indices = @transform_5, window_bounds = array<i64: 32, 192>}, {transform_indices = @transform_6, window_bounds = array<i64: 2, 3, 32>}, {transform_indices = @transform_7, window_bounds = array<i64: 2, 3, 8>}]} {
    %c0 = arith.constant 0 : index
    %c0_0 = arith.constant 0 : index
    %c0_1 = arith.constant 0 : index
    %0 = vector.load %arg2[%c0, %c0_0, %c0_1] : memref<2x8x32xf32, #tpu.memory_space<vmem>>, vector<2x8x32xf32>
    %c0_2 = arith.constant 0 : index
    %c0_3 = arith.constant 0 : index
    %1 = vector.load %arg3[%c0_2, %c0_3] : memref<2x32xf32, #tpu.memory_space<vmem>>, vector<2x32xf32>
    %c0_4 = arith.constant 0 : index
    %c0_5 = arith.constant 0 : index
    %2 = vector.load %arg6[%c0_4, %c0_5] : memref<32x192xf32, #tpu.memory_space<vmem>>, vector<32x192xf32>
    %cst = arith.constant dense<0.000000e+00> : vector<2x192xf32>
    %3 = tpu.matmul %1, %2, %cst {dimension_numbers = #tpu.dot_dimension_numbers<[1], [0], [0], [1], [0, 0, 1, 1], [], []>} : vector<2x32xf32>, vector<32x192xf32>, vector<2x192xf32> -> vector<2x192xf32>
    %c0_6 = arith.constant 0 : index
    %c0_7 = arith.constant 0 : index
    %c0_8 = arith.constant 0 : index
    %4 = vector.load %arg1[%c0_6, %c0_7, %c0_8] : memref<3x2x32xf32, #tpu.memory_space<vmem>>, vector<1x2x32xf32>
    %5 = vector.shape_cast %4 : vector<1x2x32xf32> to vector<2x32xf32>
    %c0_9 = arith.constant 0 : index
    %c0_10 = arith.constant 0 : index
    %c0_11 = arith.constant 0 : index
    %6 = vector.load %arg4[%c0_9, %c0_10, %c0_11] : memref<3x32x32xf32, #tpu.memory_space<vmem>>, vector<1x32x32xf32>
    %7 = vector.shape_cast %6 : vector<1x32x32xf32> to vector<32x32xf32>
    %cst_12 = arith.constant dense<0.000000e+00> : vector<2x32xf32>
    %8 = tpu.matmul %5, %7, %cst_12 {dimension_numbers = #tpu.dot_dimension_numbers<[1], [1], [0], [0], [0, 0, 1, 0], [], []>} : vector<2x32xf32>, vector<32x32xf32>, vector<2x32xf32> -> vector<2x32xf32>
    %c0_13 = arith.constant 0 : index
    %c0_14 = arith.constant 0 : index
    %c0_15 = arith.constant 0 : index
    %9 = vector.load %arg5[%c0_13, %c0_14, %c0_15] : memref<3x1x32xf32, #tpu.memory_space<vmem>>, vector<1x1x32xf32>
    %10 = vector.shape_cast %9 : vector<1x1x32xf32> to vector<1x32xf32>
    %11 = vector.broadcast %10 : vector<1x32xf32> to vector<2x32xf32>
    %12 = arith.addf %8, %11 : vector<2x32xf32>
    %13 = vector.extract_strided_slice %3 {offsets = [0, 0], sizes = [2, 32], strides = [1, 1]} : vector<2x192xf32> to vector<2x32xf32>
    %14 = vector.extract_strided_slice %3 {offsets = [0, 96], sizes = [2, 32], strides = [1, 1]} : vector<2x192xf32> to vector<2x32xf32>
    %15 = arith.mulf %13, %12 : vector<2x32xf32>
    %16 = arith.addf %15, %14 : vector<2x32xf32>
    %c0_16 = arith.constant 0 : index
    %c0_17 = arith.constant 0 : index
    %c0_18 = arith.constant 0 : index
    %17 = vector.load %arg9[%c0_16, %c0_17, %c0_18] : memref<2x3x32xf32, #tpu.memory_space<vmem>>, vector<2x1x32xf32>
    %18 = vector.shape_cast %17 : vector<2x1x32xf32> to vector<2x32xf32>
    %19 = vector.shape_cast %16 : vector<2x32xf32> to vector<2x1x32xf32>
    tpu.vector_store %arg9[%c0_16, %c0_17, %c0_18], %19 {strides = array<i32>} : memref<2x3x32xf32, #tpu.memory_space<vmem>>, vector<2x1x32xf32>,
    %c1 = arith.constant 1 : index
    %c0_19 = arith.constant 0 : index
    %c0_20 = arith.constant 0 : index
    %20 = vector.load %arg1[%c1, %c0_19, %c0_20] : memref<3x2x32xf32, #tpu.memory_space<vmem>>, vector<1x2x32xf32>
    %21 = vector.shape_cast %20 : vector<1x2x32xf32> to vector<2x32xf32>
    %c1_21 = arith.constant 1 : index
    %c0_22 = arith.constant 0 : index
    %c0_23 = arith.constant 0 : index
    %22 = vector.load %arg4[%c1_21, %c0_22, %c0_23] : memref<3x32x32xf32, #tpu.memory_space<vmem>>, vector<1x32x32xf32>
    %23 = vector.shape_cast %22 : vector<1x32x32xf32> to vector<32x32xf32>
    %cst_24 = arith.constant dense<0.000000e+00> : vector<2x32xf32>
    %24 = tpu.matmul %21, %23, %cst_24 {dimension_numbers = #tpu.dot_dimension_numbers<[1], [1], [0], [0], [0, 0, 1, 0], [], []>} : vector<2x32xf32>, vector<32x32xf32>, vector<2x32xf32> -> vector<2x32xf32>
    %c1_25 = arith.constant 1 : index
    %c0_26 = arith.constant 0 : index
    %c0_27 = arith.constant 0 : index
    %25 = vector.load %arg5[%c1_25, %c0_26, %c0_27] : memref<3x1x32xf32, #tpu.memory_space<vmem>>, vector<1x1x32xf32>
    %26 = vector.shape_cast %25 : vector<1x1x32xf32> to vector<1x32xf32>
    %27 = vector.broadcast %26 : vector<1x32xf32> to vector<2x32xf32>
    %28 = arith.addf %24, %27 : vector<2x32xf32>
    %29 = vector.extract_strided_slice %3 {offsets = [0, 32], sizes = [2, 32], strides = [1, 1]} : vector<2x192xf32> to vector<2x32xf32>
    %30 = vector.extract_strided_slice %3 {offsets = [0, 128], sizes = [2, 32], strides = [1, 1]} : vector<2x192xf32> to vector<2x32xf32>
    %31 = arith.mulf %29, %28 : vector<2x32xf32>
    %32 = arith.addf %31, %30 : vector<2x32xf32>
    %c0_28 = arith.constant 0 : index
    %c1_29 = arith.constant 1 : index
    %c0_30 = arith.constant 0 : index
    %33 = vector.load %arg9[%c0_28, %c1_29, %c0_30] : memref<2x3x32xf32, #tpu.memory_space<vmem>>, vector<2x1x32xf32>
    %34 = vector.shape_cast %33 : vector<2x1x32xf32> to vector<2x32xf32>
    %35 = vector.shape_cast %32 : vector<2x32xf32> to vector<2x1x32xf32>
    tpu.vector_store %arg9[%c0_28, %c1_29, %c0_30], %35 {strides = array<i32>} : memref<2x3x32xf32, #tpu.memory_space<vmem>>, vector<2x1x32xf32>,
    %c2 = arith.constant 2 : index
    %c0_31 = arith.constant 0 : index
    %c0_32 = arith.constant 0 : index
    %36 = vector.load %arg1[%c2, %c0_31, %c0_32] : memref<3x2x32xf32, #tpu.memory_space<vmem>>, vector<1x2x32xf32>
    %37 = vector.shape_cast %36 : vector<1x2x32xf32> to vector<2x32xf32>
    %c2_33 = arith.constant 2 : index
    %c0_34 = arith.constant 0 : index
    %c0_35 = arith.constant 0 : index
    %38 = vector.load %arg4[%c2_33, %c0_34, %c0_35] : memref<3x32x32xf32, #tpu.memory_space<vmem>>, vector<1x32x32xf32>
    %39 = vector.shape_cast %38 : vector<1x32x32xf32> to vector<32x32xf32>
    %cst_36 = arith.constant dense<0.000000e+00> : vector<2x32xf32>
    %40 = tpu.matmul %37, %39, %cst_36 {dimension_numbers = #tpu.dot_dimension_numbers<[1], [1], [0], [0], [0, 0, 1, 0], [], []>} : vector<2x32xf32>, vector<32x32xf32>, vector<2x32xf32> -> vector<2x32xf32>
    %c2_37 = arith.constant 2 : index
    %c0_38 = arith.constant 0 : index
    %c0_39 = arith.constant 0 : index
    %41 = vector.load %arg5[%c2_37, %c0_38, %c0_39] : memref<3x1x32xf32, #tpu.memory_space<vmem>>, vector<1x1x32xf32>
    %42 = vector.shape_cast %41 : vector<1x1x32xf32> to vector<1x32xf32>
    %43 = vector.broadcast %42 : vector<1x32xf32> to vector<2x32xf32>
    %44 = arith.addf %40, %43 : vector<2x32xf32>
    %45 = vector.extract_strided_slice %3 {offsets = [0, 64], sizes = [2, 32], strides = [1, 1]} : vector<2x192xf32> to vector<2x32xf32>
    %46 = vector.extract_strided_slice %3 {offsets = [0, 160], sizes = [2, 32], strides = [1, 1]} : vector<2x192xf32> to vector<2x32xf32>
    %47 = arith.mulf %45, %44 : vector<2x32xf32>
    %48 = arith.addf %47, %46 : vector<2x32xf32>
    %c0_40 = arith.constant 0 : index
    %c2_41 = arith.constant 2 : index
    %c0_42 = arith.constant 0 : index
    %49 = vector.load %arg9[%c0_40, %c2_41, %c0_42] : memref<2x3x32xf32, #tpu.memory_space<vmem>>, vector<2x1x32xf32>
    %50 = vector.shape_cast %49 : vector<2x1x32xf32> to vector<2x32xf32>
    %51 = vector.shape_cast %48 : vector<2x32xf32> to vector<2x1x32xf32>
    tpu.vector_store %arg9[%c0_40, %c2_41, %c0_42], %51 {strides = array<i32>} : memref<2x3x32xf32, #tpu.memory_space<vmem>>, vector<2x1x32xf32>,
    %c0_43 = arith.constant 0 : index
    %c0_44 = arith.constant 0 : index
    %c0_45 = arith.constant 0 : index
    %52 = vector.load %arg9[%c0_43, %c0_44, %c0_45] : memref<2x3x32xf32, #tpu.memory_space<vmem>>, vector<2x3x32xf32>
    "tpu.trace_start"() <{level = 10 : i32, message = "bik,bsk->bis"}> : () -> ()
    %cst_46 = arith.constant dense<0.000000e+00> : vector<2x3x8xf32>
    %53 = tpu.matmul %52, %0, %cst_46 {dimension_numbers = #tpu.dot_dimension_numbers<[2], [2], [1], [1], [0, 0, 0, 1, 1, 1], [0], [0]>} : vector<2x3x32xf32>, vector<2x8x32xf32>, vector<2x3x8xf32> -> vector<2x3x8xf32>
    "tpu.trace_stop"() : () -> ()
    %cst_47 = arith.constant dense<0xFF800000> : vector<2x3xf32>
    %54 = vector.multi_reduction <maximumf>, %53, %cst_47 [2] : vector<2x3x8xf32> to vector<2x3xf32>
    %55 = vector.shape_cast %54 : vector<2x3xf32> to vector<2x3x1xf32>
    %56 = vector.broadcast %55 : vector<2x3x1xf32> to vector<2x3x8xf32>
    %57 = arith.subf %53, %56 : vector<2x3x8xf32>
    %58 = math.exp %57 : vector<2x3x8xf32>
    %cst_48 = arith.constant dense<0.000000e+00> : vector<2x3xf32>
    %59 = vector.multi_reduction <add>, %58, %cst_48 [2] : vector<2x3x8xf32> to vector<2x3xf32>
    %60 = vector.shape_cast %59 : vector<2x3xf32> to vector<2x3x1xf32>
    %61 = vector.broadcast %60 : vector<2x3x1xf32> to vector<2x3x8xf32>
    %62 = arith.divf %58, %61 : vector<2x3x8xf32>
    %c0_49 = arith.constant 0 : index
    %c0_50 = arith.constant 0 : index
    %c0_51 = arith.constant 0 : index
    %63 = vector.load %arg8[%c0_49, %c0_50, %c0_51] : memref<2x3x8xf32, #tpu.memory_space<vmem>>, vector<2x3x8xf32>
    tpu.vector_store %arg8[%c0_49, %c0_50, %c0_51], %62 {strides = array<i32>} : memref<2x3x8xf32, #tpu.memory_space<vmem>>, vector<2x3x8xf32>,
    "tpu.trace_start"() <{level = 10 : i32, message = "bis,bsd->bid"}> : () -> ()
    %cst_52 = arith.constant dense<0.000000e+00> : vector<2x3x32xf32>
    %64 = tpu.matmul %62, %0, %cst_52 {dimension_numbers = #tpu.dot_dimension_numbers<[2], [1], [1], [2], [0, 0, 0, 1, 1, 2], [0], [0]>} : vector<2x3x8xf32>, vector<2x8x32xf32>, vector<2x3x32xf32> -> vector<2x3x32xf32>
    "tpu.trace_stop"() : () -> ()
    %c0_53 = arith.constant 0 : index
    %c0_54 = arith.constant 0 : index
    %c0_55 = arith.constant 0 : index
    %65 = vector.load %arg7[%c0_53, %c0_54, %c0_55] : memref<2x3x32xf32, #tpu.memory_space<vmem>>, vector<2x3x32xf32>
    tpu.vector_store %arg7[%c0_53, %c0_54, %c0_55], %64 {strides = array<i32>} : memref<2x3x32xf32, #tpu.memory_space<vmem>>, vector<2x3x32xf32>,
    return
  }
  func.func @transform_0(%arg0: i32) -> (i32, i32, i32) {
    %c0_i32 = arith.constant 0 : i32
    %c0_i32_0 = arith.constant 0 : i32
    %c0_i32_1 = arith.constant 0 : i32
    return %c0_i32, %arg0, %c0_i32_0 : i32, i32, i32
  }
  func.func @transform_1(%arg0: i32) -> (i32, i32, i32) {
    %c0_i32 = arith.constant 0 : i32
    %c0_i32_0 = arith.constant 0 : i32
    %c0_i32_1 = arith.constant 0 : i32
    return %arg0, %c0_i32, %c0_i32_0 : i32, i32, i32
  }
  func.func @transform_2(%arg0: i32) -> (i32, i32) {
    %c0_i32 = arith.constant 0 : i32
    %c0_i32_0 = arith.constant 0 : i32
    return %arg0, %c0_i32 : i32, i32
  }
  func.func @transform_3(%arg0: i32) -> (i32, i32, i32) {
    %c0_i32 = arith.constant 0 : i32
    %c0_i32_0 = arith.constant 0 : i32
    %c0_i32_1 = arith.constant 0 : i32
    %c0_i32_2 = arith.constant 0 : i32
    return %c0_i32, %c0_i32_0, %c0_i32_1 : i32, i32, i32
  }
  func.func @transform_4(%arg0: i32) -> (i32, i32, i32) {
    %c0_i32 = arith.constant 0 : i32
    %c0_i32_0 = arith.constant 0 : i32
    %c0_i32_1 = arith.constant 0 : i32
    %c0_i32_2 = arith.constant 0 : i32
    return %c0_i32, %c0_i32_0, %c0_i32_1 : i32, i32, i32
  }
  func.func @transform_5(%arg0: i32) -> (i32, i32) {
    %c0_i32 = arith.constant 0 : i32
    %c0_i32_0 = arith.constant 0 : i32
    %c0_i32_1 = arith.constant 0 : i32
    return %c0_i32, %c0_i32_0 : i32, i32
  }
  func.func @transform_6(%arg0: i32) -> (i32, i32, i32) {
    %c0_i32 = arith.constant 0 : i32
    %c0_i32_0 = arith.constant 0 : i32
    %c0_i32_1 = arith.constant 0 : i32
    return %arg0, %c0_i32, %c0_i32_0 : i32, i32, i32
  }
  func.func @transform_7(%arg0: i32) -> (i32, i32, i32) {
    %c0_i32 = arith.constant 0 : i32
    %c0_i32_0 = arith.constant 0 : i32
    %c0_i32_1 = arith.constant 0 : i32
    return %arg0, %c0_i32, %c0_i32_0 : i32, i32, i32
  }
}

</mosaic_0001>

<bundles_post_ra>
// kernel: tpu_custom_call.1
= control target key start
LH: loop header
LB: loop body
LE: loop exit
PB: predicated region body
PF: predicated region fallthrough
CT: control target
= control target key end

     0   :  { %13 = vsyncpa [#allocation4], 0  ;;  %s1390_s0 = inlined_call_operand.hbm [shape: f32[3,2,32], index: 0, kind: input, shape index: {}]   ;;  %s1391_s1 = inlined_call_operand.hbm [shape: f32[2,8,32], index: 1, kind: input, shape index: {}]   ;;  %s1392_s2 = inlined_call_operand.vmem [shape: f32[2,32], index: 2, kind: input, shape index: {}]   ;;  %s1393_s3 = inlined_call_operand.hbm [shape: f32[3,32,32], index: 3, kind: input, shape index: {}]   ;;  %s1394_s4 = inlined_call_operand.vmem [shape: f32[3,1,32], index: 4, kind: input, shape index: {}]   ;;  %s1395_s5 = inlined_call_operand.hbm [shape: f32[32,192], index: 5, kind: input, shape index: {}]   ;;  %s1396_s6 = inlined_call_operand.vmem [shape: f32[2,3,32], index: 6, kind: output, shape index: {0}]   ;;  %s1397_s7 = inlined_call_operand.vmem [shape: f32[2,3,8], index: 7, kind: output, shape index: {1}]  }
   0x1   :  { %14 = vsyncpa [#allocation6], 0 }
   0x2   :  { %15 = vsyncpa [#allocation9], 0  ;;  %s1184_s24 = smov [#allocation5]   ;;  %s1090_s28 = scalar_lea.hbm %s1391_s1, 256 }
   0x3   :  { %s33_s25 = sshll.u32 %s1184_s24, 4  ;;  %p1091_p0 = scmp.ne.s32.totalorder %s1391_s1, %s1090_s28  ;;  %s34_s25 = int_to_ptr.vmem [resolvable:$true] %s33_s25 }
   0x4   :  { %p1094_p1 = scmp.lt.u32.totalorder %s1090_s28, %s1391_s1 }
   0x6   :  { %p1096_p2 = pnand %p1094_p1, %p1091_p0 }
   0x8   :  { %1099 = shalt.err (!%p1096_p2)
}
   0x9   :  { %s1100_s10 = scalar_lea.vmem %s34_s25, 256  ;;  %p1105_p4 = scmp.lt.s32.totalorder %s34_s25, %s34_s25 }
   0xa   :  { %p1101_p3 = scmp.ne.s32.totalorder %s34_s25, %s1100_s10  ;;  %p1106_p5 = scmp.lt.s32.totalorder %s1100_s10, %s1100_s10 }
   0xc   :  { %p1107_p6 = por %p1106_p5, %p1105_p4 }
   0xe   :  { %p1108_p7 = pnand %p1107_p6, %p1101_p3 }
  0x10   :  { %1111 = shalt.err (!%p1108_p7)
}
  0x11   :  { %s1185_s11 = smov 128   ;;  %s1186_s12 = smov 8  }
  0x12   :  { %39 = dma.hbm_to_vmem [thread:$0]  %s1391_s1, 256, %s34_s25, [#allocation6], %s1185_s11, %s1185_s11, %s1186_s12  }
  0x13   :  { %s1187_s15 = smov [#allocation3]   ;;  %s1112_s19 = scalar_lea.hbm %s1390_s0, 96 }
  0x14   :  { %s21_s16 = sshll.u32 %s1187_s15, 4  ;;  %p1113_p8 = scmp.ne.s32.totalorder %s1390_s0, %s1112_s19  ;;  %s22_s16 = int_to_ptr.vmem [resolvable:$true] %s21_s16 }
  0x15   :  { %p1116_p9 = scmp.lt.u32.totalorder %s1112_s19, %s1390_s0 }
  0x17   :  { %p1118_p10 = pnand %p1116_p9, %p1113_p8 }
  0x19   :  { %1121 = shalt.err (!%p1118_p10)
}
  0x1a   :  { %s1122_s24 = scalar_lea.vmem %s22_s16, 96  ;;  %p1127_p12 = scmp.lt.s32.totalorder %s22_s16, %s22_s16 }
  0x1b   :  { %p1123_p11 = scmp.ne.s32.totalorder %s22_s16, %s1122_s24  ;;  %p1128_p13 = scmp.lt.s32.totalorder %s1122_s24, %s1122_s24 }
  0x1d   :  { %p1129_p0 = por %p1128_p13, %p1127_p12 }
  0x1f   :  { %p1130_p1 = pnand %p1129_p0, %p1123_p11 }
  0x21   :  { %1133 = shalt.err (!%p1130_p1)
}
  0x22   :  { %s1188_s1 = smov 32   ;;  %s1189_s25 = smov 2  }
  0x23   :  { %27 = dma.hbm_to_vmem [thread:$0]  %s1390_s0, 96, %s22_s16, [#allocation4], %s1188_s1, %s1188_s1, %s1189_s25  }
  0x24   :  { %s1190_s28 = smov [#allocation7]   ;;  %s1191_s30 = smov [#allocation8]  }
  0x25   :  { %s47_s29 = sshll.u32 %s1190_s28, 4  ;;  %s61_s8 = sshll.u32 %s1191_s30, 4  ;;  %s48_s29 = int_to_ptr.vmem [resolvable:$true] %s47_s29  ;;  %s1269_s8 = int_to_ptr.vmem [resolvable:$true] %s61_s8 }
  0x26   :  { %s1134_s13 = scalar_lea.hbm %s1393_s3, 1536 }
  0x27   :  { %p1135_p2 = scmp.ne.s32.totalorder %s1393_s3, %s1134_s13  ;;  %p1138_p3 = scmp.lt.u32.totalorder %s1134_s13, %s1393_s3 }
  0x29   :  { %p1140_p4 = pnand %p1138_p3, %p1135_p2 }
  0x2b   :  { %1143 = shalt.err (!%p1140_p4)
}
  0x2c   :  { %s1144_s0 = scalar_lea.vmem %s48_s29, 1536  ;;  %p1149_p6 = scmp.lt.s32.totalorder %s48_s29, %s48_s29 }
  0x2d   :  { %p1145_p5 = scmp.ne.s32.totalorder %s48_s29, %s1144_s0  ;;  %p1150_p7 = scmp.lt.s32.totalorder %s1144_s0, %s1144_s0 }
  0x2f   :  { %p1151_p8 = por %p1150_p7, %p1149_p6 }
  0x31   :  { %p1152_p9 = pnand %p1151_p8, %p1145_p5 }
  0x33   :  { %1155 = shalt.err (!%p1152_p9)
}
  0x34   :  { %53 = dma.hbm_to_vmem [thread:$0]  %s1393_s3, 1536, %s48_s29, [#allocation6], %s1185_s11, %s1185_s11, %s1186_s12  }
  0x35   :  { %s1156_s22 = scalar_lea.hbm %s1395_s5, 1024 }
  0x36   :  { %p1157_p10 = scmp.ne.s32.totalorder %s1395_s5, %s1156_s22  ;;  %p1160_p11 = scmp.lt.u32.totalorder %s1156_s22, %s1395_s5 }
  0x38   :  { %p1162_p12 = pnand %p1160_p11, %p1157_p10 }
  0x3a   :  { %1165 = shalt.err (!%p1162_p12)
}
  0x3b   :  { %s1166_s27 = scalar_lea.vmem %s1269_s8, 1024  ;;  %p1171_p0 = scmp.lt.s32.totalorder %s1269_s8, %s1269_s8 }
  0x3c   :  { %p1167_p13 = scmp.ne.s32.totalorder %s1269_s8, %s1166_s27  ;;  %p1172_p1 = scmp.lt.s32.totalorder %s1166_s27, %s1166_s27 }
  0x3e   :  { %p1173_p2 = por %p1172_p1, %p1171_p0 }
  0x40   :  { %p1174_p3 = pnand %p1173_p2, %p1167_p13 }
  0x42   :  { %1177 = shalt.err (!%p1174_p3)
}
  0x43   :  { %s1192_s3 = smov 256   ;;  %s1193_s11 = smov 16  }
  0x44   :  { %67 = dma.hbm_to_vmem [thread:$0]  %s1395_s5, 1024, %s1269_s8, [#allocation9], %s1192_s3, %s1192_s3, %s1193_s11  }
  0x45   :  { %1178 = dma.done.wait [#allocation4], 96  }
  0x46   :  { %1179 = vsyncadd [#allocation4], 4294967200 }
  0x47   :  { %1180 = dma.done.wait [#allocation6], 1792  }
  0x48   :  { %1181 = vsyncadd [#allocation6], 4294965504 }
  0x49   :  { %1182 = dma.done.wait [#allocation9], 1024  }
  0x4a   :  { %1183 = vsyncadd [#allocation9], 4294966272  ;;  %v1194_v0 = vmov 0.0|0.0   ;;  %v1195_v1 = vmov 0.0   ;;  %vm1196_vm0 = vmmov 0   ;;  %vm91_vm1 = vcmask 261120  }
  0x4b   :  { %1042 = vmatprep.subr.bf16.mxu1 %v1194_v0  ;;  %159 = vmatprep.mubr.f32.mxu0 %v1195_v1  ;;  %vm1308_vm2 = vmpackc.low %vm91_vm1, %vm91_vm1  ;;  %v84_v3 = vld [vmem:[#allocation8 + $0x8] sm:$0xff]  ;;  %v86_v4 = vld [vmem:[#allocation8 + $0x18] sm:$0xff]  ;;  %s1197_s14 = smov 64   ;;  %v1198_v52 = vmov 1966171168   ;;  %v273_v54 = vlaneseq  ;;  %vm294_vm3 = vcmask 253952  }
  0x4c   :  { %989 = vmatprep.mubr.msk.f32.mxu1 %vm1196_vm0, %v1195_v1  ;;  %v167_v5 = vld [vmem:[#allocation7] sm:$0xff]  ;;  %v1034_v6 = vpack.c.bf16 %v86_v4, %v84_v3  ;;  %v168_v7 = vld [vmem:[#allocation7 + $0x8] sm:$0xff]  ;;  %v85_v9 = vld [vmem:[#allocation8 + $0x10] sm:$0xff]  ;;  %v271_v53 = vunpack.c.l.s4 %v1198_v52  ;;  %vm745_vm4 = vcmask 59392   ;;  %vm770_vm5 = vcmask 64512  }
  0x4d   :  { %v83_v8 = vld [vmem:[#allocation8] sm:$0xff]  ;;  %v1043_v10 = vpack.c.bf16 %v168_v7, %v167_v5  ;;  %v88_v12 = vld [vmem:[#allocation8 + $0x28] sm:$0xff]  ;;  %v90_v13 = vld [vmem:[#allocation8 + $0x38] sm:$0xff]  ;;  %v274_v56 = vshrl.u32 %v273_v54, 7  ;;  %vm917_vm6 = vcmask 256000  }
  0x4e   :  { %v1036_v11 = vpack.c.bf16 %v85_v9, %v83_v8  ;;  %v87_v14 = vld [vmem:[#allocation8 + $0x20] sm:$0xff]  ;;  %1035 = vmatprep.subr.bf16.mxu0 %v1034_v6  ;;  %v1038_v15 = vpack.c.bf16 %v90_v13, %v88_v12  ;;  %v89_v16 = vld [vmem:[#allocation8 + $0x30] sm:$0xff]  ;;  %v170_v19 = vld [vmem:[#allocation7 + $0x18] sm:$0xff]  ;;  %v272_v55 = vunpack.c.0.s8 %v271_v53 }
  0x4f   :  { %1045 = vmatpush3.bf16.xpose.msk.msra.mxu1 %vm1308_vm2, %v1043_v10  ;;  %v1040_v17 = vpack.c.bf16 %v89_v16, %v87_v14  ;;  %v169_v18 = vld [vmem:[#allocation7 + $0x10] sm:$0xff]  ;;  %v82_v20 = vld [vmem:[%s1392_s2] sm:$0x3]  ;;  %v301_v23 = vld [vmem:[#allocation7 + $0x28] sm:$0xff]  ;;  %v432_v8 = vsub.s32 0, %v274_v56 }
  0x50   :  { %1037 = vmatpush1.bf16.msra.mxu0 %v1036_v11  ;;  %1046 = vmatprep.subr.bf16.mxu1 %v1194_v0  ;;  %v1047_v21 = vpack.c.bf16 %v170_v19, %v169_v18  ;;  %v300_v22 = vld [vmem:[#allocation7 + $0x20] sm:$0xff]  ;;  %v450_v26 = vld [vmem:[#allocation7 + $0x48] sm:$0xff]  ;;  %v302_v29 = vld [vmem:[#allocation7 + $0x30] sm:$0xff]  ;;  %v275_v58 = vsub.s32 %v272_v55, %v274_v56 }
  0x51   :  { %1039 = vmatprep.subr.bf16.mxu0 %v1038_v15  ;;  %v1051_v24 = vpack.c.bf16 %v301_v23, %v300_v22  ;;  %v449_v25 = vld [vmem:[#allocation7 + $0x40] sm:$0xff]  ;;  %v166_v27 = vld [vmem:[#allocation3] sm:$0x3]  ;;  %v303_v30 = vld [vmem:[#allocation7 + $0x38] sm:$0xff] }
  0x52   :  { %v1059_v28 = vpack.c.bf16 %v450_v26, %v449_v25  ;;  %v1055_v31 = vpack.c.bf16 %v303_v30, %v302_v29  ;;  %v451_v32 = vld [vmem:[#allocation7 + $0x50] sm:$0xff]  ;;  %v452_v33 = vld [vmem:[#allocation7 + $0x58] sm:$0xff]  ;;  %v298_v35 = vld [vmem:[#allocation3 + $0x2] sm:$0x3] }
  0x53   :  { %v1063_v34 = vpack.c.bf16 %v452_v33, %v451_v32  ;;  %v447_v36 = vld [vmem:[#allocation3 + $0x4] sm:$0x3]  ;;  %v932_v39 = vld [vmem:[%s1394_s4] ss:$0 sm:$0xff]  ;;  %v939_v44 = vld [vmem:[%s1394_s4 + $0x1] ss:$0 sm:$0xff] }
  0x54   :  { %1041 = vmatpush1.bf16.msra.mxu0 %v1040_v17  ;;  %v946_v47 = vld [vmem:[%s1394_s4 + $0x2] ss:$0 sm:$0xff]  ;;  %v80_v9 = vld [vmem:[#allocation5] sm:$0xff]  ;;  %v81_v16 = vld [vmem:[#allocation5 + $0x8] sm:$0xff]  ;;  %s1199_s4 = smov 96  }
  0x55   :  { %1050 = vmatprep.subr.bf16.mxu0 %v1194_v0 }
  0x57   :  { %931 = vmatmul.mubr.msk.f32.vlgmr.msra.gmra.mrb[0].mxu0 %vm91_vm1, %v82_v20  ;;  %1049 = vmatpush3.bf16.xpose.msk.msra.mxu1 %vm1308_vm2, %v1047_v21 }
  0x58   :  { %1000 = vmatprep.mubr.msk.f32.mxu0 %vm1196_vm0, %v1195_v1  ;;  %1058 = vmatprep.subr.bf16.mxu1 %v1194_v0 }
  0x5d   :  { %1053 = vmatpush3.bf16.xpose.msk.msra.mxu0 %vm1308_vm2, %v1051_v24 }
  0x5e   :  { %1054 = vmatprep.subr.bf16.mxu0 %v1194_v0  ;;  %990 = vmatmul.mubr.msk.f32.vlgmr.msra.gmra.mrb[0].mxu1 %vm91_vm1, %v166_v27 }
  0x5f   :  { %1061 = vmatpush3.bf16.xpose.msk.msra.mxu1 %vm1308_vm2, %v1059_v28  ;;  %1011 = vmatprep.mubr.msk.f32.mxu1 %vm1196_vm0, %v1195_v1 }
  0x60   :  { %1062 = vmatprep.subr.bf16.mxu1 %v1194_v0 }
  0x65   :  { %1057 = vmatpush3.bf16.xpose.msk.msra.mxu0 %vm1308_vm2, %v1055_v31 }
  0x66   :  { %1014 = vmatprep.subr.mxu0 %v1195_v1 }
  0x67   :  { %1065 = vmatpush3.bf16.xpose.msk.msra.mxu1 %vm1308_vm2, %v1063_v34 }
  0x68   :  { %1029 = vmatprep.subr.mxu1 %v1195_v1 }
  0x6c   :  { %1001 = vmatmul.mubr.msk.f32.vlgmr.msra.gmra.mrb[2].mxu0 %vm91_vm1, %v298_v35 }
  0x6d   :  { %1016 = vmatprep.mubr.msk.f32.mxu0 %vm1196_vm0, %v1195_v1  ;;  %1015 = vmatpush3.xpose.msk.msra.mxu0 %vm91_vm1, %v80_v9 }
  0x6e   :  { %1012 = vmatmul.mubr.msk.f32.vlgmr.msra.gmra.mrb[2].mxu1 %vm91_vm1, %v447_v36  ;;  %1019 = vmatprep.subr.mxu0 %v1195_v1 }
  0x6f   :  { %1031 = vmatprep.mubr.msk.f32.mxu1 %vm1196_vm0, %v1195_v1  ;;  %1030 = vmatpush3.msra.mxu1 %v81_v16 }
 0x12a   :  { %v161_v37 = vpop.f32.mrb[0].mxu0 }
 0x12b   :  { %v163_v38 = vpop.f32.mrb[1].mxu0 }
 0x12c   :  { %403 = vrot.lane.b32.xlu1 %v163_v38, %s1188_s1 }
 0x130   :  { %265 = vrot.lane.b32.xlu1 %v161_v37, %s1188_s1 }
 0x131   :  { %v259_v40 = vpop.f32.mrb[0].mxu1 }
 0x132   :  { %v260_v41 = vadd.f32 %v932_v39, %v259_v40  ;;  %v991_v42 = vpop.f32.mrb[1].mxu1 }
 0x134   :  { %v263_v43 = vmul.f32 %v260_v41, %v161_v37 }
 0x13f   :  { %v393_v45 = vpop.f32.mrb[2].mxu0 }
 0x140   :  { %v1002_v46 = vpop.f32.mrb[3].mxu0  ;;  %v394_v48 = vadd.f32 %v939_v44, %v393_v45 }
 0x141   :  { %v542_v49 = vpop.f32.mrb[2].mxu1 }
 0x142   :  { %398 = vrot.lane.b32.xlu0 %v394_v48, %s1188_s1  ;;  %v543_v50 = vadd.f32 %v946_v47, %v542_v49  ;;  %v1013_v51 = vpop.f32.mrb[3].mxu1 }
 0x146   :  { %547 = vrot.lane.b32.xlu0 %v543_v50, %s1197_s14 }
 0x19e   :  { %v404_v57 = vpop.permute.xlu1 %403 }
 0x1a2   :  { %v266_v59 = vpop.permute.xlu1 %265 }
 0x1a3   :  { %v268_v60 = vadd.f32 %v266_v59, %v263_v43 }
 0x1a5   :  { %v276_v61 = vrot.slane %v268_v60, %v275_v58 }
 0x1a7   :  { %v277_v62 = vcombine.high %v276_v61, %v276_v61  ;;  %v284_v63 = vrot.slane %v276_v61, %v275_v58 }
 0x1a9   :  { %v291_v0 = vrot.slane %v277_v62, %v275_v58  ;;  %295 = vst.msk [vmem:[#allocation2] sm:$0x1] %vm294_vm3, %v284_v63 }
 0x1ab   :  { %296 = vst.msk [vmem:[#allocation2 + $0x4] sm:$0x1] %vm294_vm3, %v291_v0 }
 0x1b4   :  { %v399_v2 = vpop.permute.xlu0 %398 }
 0x1b5   :  { %v401_v3 = vmul.f32 %v399_v2, %v161_v37 }
 0x1b7   :  { %v406_v4 = vadd.f32 %v404_v57, %v401_v3 }
 0x1b8   :  { %v548_v5 = vpop.permute.xlu0 %547 }
 0x1b9   :  { %v414_v6 = vrot.slane %v406_v4, %v275_v58  ;;  %v550_v7 = vmul.f32 %v548_v5, %v161_v37 }
 0x1bb   :  { %v415_v10 = vcombine.high %v414_v6, %v414_v6  ;;  %v551_v11 = vadd.f32 %v550_v7, %v404_v57  ;;  %v422_v12 = vrot.slane %v414_v6, %v275_v58 }
 0x1bd   :  { %v559_v13 = vrot.slane %v551_v11, %v275_v58  ;;  %v433_v14 = vrot.slane %v422_v12, %v432_v8  ;;  %v429_v15 = vrot.slane %v415_v10, %v275_v58 }
 0x1bf   :  { %v560_v17 = vcombine.high %v559_v13, %v559_v13  ;;  %438 = vrot.lane.b32.xlu0 %v433_v14, %s1199_s4  ;;  %v567_v18 = vrot.slane %v559_v13, %v275_v58  ;;  %v437_v19 = vrot.slane %v429_v15, %v432_v8 }
 0x1c1   :  { %v578_v20 = vrot.slane %v567_v18, %v432_v8  ;;  %v574_v21 = vrot.slane %v560_v17, %v275_v58 }
 0x1c3   :  { %440 = vrot.lane.b32.xlu0 %v437_v19, %s1199_s4  ;;  %583 = vrot.lane.b32.xlu1 %v578_v20, %s1197_s14  ;;  %v582_v22 = vrot.slane %v574_v21, %v432_v8 }
 0x1c7   :  { %585 = vrot.lane.b32.xlu1 %v582_v22, %s1197_s14 }
 0x231   :  { %v439_v23 = vpop.permute.xlu0 %438 }
 0x232   :  { %444 = vst.msk [vmem:[#allocation2 + $0x1] sm:$0x1] %vm294_vm3, %v439_v23 }
 0x235   :  { %v584_v24 = vpop.permute.xlu1 %583  ;;  %v441_v25 = vpop.permute.xlu0 %440 }
 0x236   :  { %589 = vst.msk [vmem:[#allocation2 + $0x2] sm:$0x1] %vm294_vm3, %v584_v24  ;;  %445 = vst.msk [vmem:[#allocation2 + $0x5] sm:$0x1] %vm294_vm3, %v441_v25 }
 0x239   :  { %v586_v26 = vpop.permute.xlu1 %585 }
 0x23a   :  { %590 = vst.msk [vmem:[#allocation2 + $0x6] sm:$0x1] %vm294_vm3, %v586_v26 }
 0x23d   :  { %v591_v27 = vld [vmem:[#allocation2] sm:$0x7] }
 0x23e   :  { %1017 = vmatmul.mubr.msk.f32.vlgmr.msra.gmra.mrb[4].mxu0 %vm91_vm1, %v591_v27 }
 0x23f   :  { %1020 = vmatpush3.xpose.msk.msra.mxu0 %vm91_vm1, %v81_v16  ;;  %1021 = vmatprep.mubr.msk.f32.mxu0 %vm1196_vm0, %v1195_v1 }
 0x240   :  { %1024 = vmatprep.subr.mxu0 %v1195_v1 }
 0x241   :  { %v592_v28 = vld [vmem:[#allocation2 + $0x4] sm:$0x7] }
 0x242   :  { %1022 = vmatmul.mubr.msk.f32.vlgmr.msra.gmra.mrb[6].mxu0 %vm91_vm1, %v592_v28 }
 0x243   :  { %1025 = vmatpush3.msra.mxu0 %v80_v9  ;;  %1026 = vmatprep.mubr.msk.f32.mxu0 %vm1196_vm0, %v1195_v1 }
 0x311   :  { %v665_v29 = vpop.f32.mrb[4].mxu0 }
 0x312   :  { %v1018_v30 = vpop.f32.mrb[5].mxu0  ;;  %v746_v31 = vsel %vm745_vm4, %v665_v29, -inf }
 0x313   :  { %747 = vmax.xlane.f32.xlu0 %v746_v31 }
 0x315   :  { %v741_v32 = vpop.f32.mrb[6].mxu0 }
 0x316   :  { %v1023_v33 = vpop.f32.mrb[7].mxu0  ;;  %v749_v34 = vsel %vm745_vm4, %v741_v32, -inf }
 0x317   :  { %750 = vmax.xlane.f32.xlu1 %v749_v34 }
 0x3a0   :  { %v748_v35 = vpop.xlane.xlu0 %747 }
 0x3a1   :  { %v752_v36 = vsub.f32 %v665_v29, %v748_v35 }
 0x3a3   :  { %v754_v37 = vmul.f32 1.442695, %v752_v36 }
 0x3a4   :  { %v751_v38 = vpop.xlane.xlu1 %750 }
 0x3a5   :  { %1082 = vpow2.f32 %v754_v37  ;;  %v753_v39 = vsub.f32 %v741_v32, %v751_v38 }
 0x3a7   :  { %v756_v40 = vmul.f32 1.442695, %v753_v39 }
 0x3a9   :  { %1084 = vpow2.f32 %v756_v40 }
 0x3af   :  { %v1083_v1 = vpop.eup %1082 }
 0x3b0   :  { %v758_v41 = vsel %vm745_vm4, %v1083_v1, 0.0 }
 0x3b1   :  { %759 = vadd.xlane.f32.xlu0 %v758_v41 }
 0x3b3   :  { %v1085_v42 = vpop.eup %1084 }
 0x3b4   :  { %v761_v43 = vsel %vm745_vm4, %v1085_v42, 0.0 }
 0x3b5   :  { %762 = vadd.xlane.f32.xlu0 %v761_v43 }
 0x43e   :  { %v760_v44 = vpop.xlane.xlu0 %759 }
 0x43f   :  { %1086 = vrcp.f32 %v760_v44 }
 0x442   :  { %v763_v45 = vpop.xlane.xlu0 %762 }
 0x443   :  { %1088 = vrcp.f32 %v763_v45 }
 0x449   :  { %v1087_v46 = vpop.eup %1086 }
 0x44a   :  { %v765_v47 = vmul.f32 %v1087_v46, %v1083_v1 }
 0x44c   :  { %768 = vst.msk [vmem:[%s1397_s7] sm:$0x7] %vm745_vm4, %v765_v47  ;;  %1027 = vmatmul.mubr.msk.f32.vlgmr.msra.gmra.mrb[8].mxu0 %vm770_vm5, %v765_v47 }
 0x44d   :  { %v1089_v48 = vpop.eup %1088 }
 0x44e   :  { %v767_v49 = vmul.f32 %v1089_v48, %v1085_v42 }
 0x450   :  { %769 = vst.msk [vmem:[%s1397_s7 + $0x4] sm:$0x7] %vm745_vm4, %v767_v49  ;;  %1032 = vmatmul.mubr.msk.f32.vlgmr.msra.gmra.mrb[4].mxu1 %vm770_vm5, %v767_v49 }
 0x51f   :  { %v840_v50 = vpop.f32.mrb[8].mxu0 }
 0x520   :  { %918 = vst.msk [vmem:[%s1396_s6] sm:$0x7] %vm917_vm6, %v840_v50  ;;  %v1028_v51 = vpop.f32.mrb[9].mxu0 }
 0x523   :  { %v913_v52 = vpop.f32.mrb[4].mxu1 }
 0x524   :  { %919 = vst.msk [vmem:[%s1396_s6 + $0x4] sm:$0x7] %vm917_vm6, %v913_v52  ;;  %v1033_v53 = vpop.f32.mrb[5].mxu1 }
 0x525   :  { %928 = vsyncpa [#allocation4], 1 }
 0x526   :  { %929 = vsyncpa [#allocation6], 1 }
 0x527   :  { %930 = vsyncpa [#allocation9], 1 }

</bundles_post_ra>
